<compile_context>
chip_gen: v5e
topology: v5e:2x2
jax: 0.10.0
libtpu: 0.0.40
codegen_flags: <defaults>
</compile_context>

<pallas_src>
import jax
import jax.numpy as jnp
from jax.experimental import pallas as pl
from jax.experimental.pallas import tpu as pltpu

N_INPUT = 14
N_HIDDEN_1 = 56
N_HIDDEN_2 = 112
N_HIDDEN_3 = 56
N_OUTPUT = 5

LANE = 128              # hidden dims zero-padded to one lane tile (on the tiny weights only)
SUBLANE = 8
N_IN_AUG = N_INPUT + 1  # +1 constant-1 column that carries b1
N_OUT_PAD = 8           # output lanes padded 5 -> 8 (lane dim == full array dim for BlockSpec)
NEG_SLOPE = 0.01        # torch.nn.LeakyReLU default negative_slope

TB_DEFAULT = 4096       # batch rows per grid step
TB_MAX = 4096           # keeps double-buffered I/O + f32 intermediates well under 32 MiB VMEM
MIN_TILES = 4           # aim for >= 4 grid steps so v7x's two TensorCores both get work
VMEM_LIMIT_BYTES = 32 * 1024 * 1024   # explicit: v5e default scoped VMEM is only 16 MiB


def _leaky_relu(x):
    # max(x, a*x) == LeakyReLU(x) for 0 <= a <= 1; one VALU op fewer than compare+select.
    return jnp.maximum(x, NEG_SLOPE * x)


def mlp_kernel(x_ref, w1_ref, w2_ref, w3_ref, w4_ref, b_ref, o_ref):
    """One batch tile of the full 4-layer MLP; weights/biases stay VMEM-resident."""
    cdt = w1_ref.dtype                      # matmul-input dtype (bf16 by default)
    b = b_ref[...]                          # (8, 128) f32: rows 0..2 = b2, b3, b4 (zero padded)

    # Layer 1: b1 is folded into w1 via the constant-1 column of x (no bias add needed).
    h = jnp.dot(x_ref[...], w1_ref[...], preferred_element_type=jnp.float32)
    h = _leaky_relu(h)

    h = jnp.dot(h.astype(cdt), w2_ref[...], preferred_element_type=jnp.float32)
    h = _leaky_relu(h + b[0:1, :])

    h = jnp.dot(h.astype(cdt), w3_ref[...], preferred_element_type=jnp.float32)
    h = _leaky_relu(h + b[1:2, :])

    h = jnp.dot(h.astype(cdt), w4_ref[...], preferred_element_type=jnp.float32)
    h = h + b[2:3, :N_OUT_PAD]

    o_ref[...] = jax.nn.sigmoid(h)          # exp + reciprocal routed to the EUP


def _round_up(n, m):
    return ((n + m - 1) // m) * m


def mlp_forward(x, params, *, matmul_dtype=jnp.bfloat16, tb=TB_DEFAULT):
    """x: (B, N_INPUT). params: w{i} (in, out), b{i} (out,). Returns (B, N_OUTPUT) float32.

    Note: params use (in_features, out_features) layout; torch.nn.Linear.weight is the
    transpose (out_features, in_features) -- transpose when importing real PyTorch weights.
    """
    B = x.shape[0]
    f32 = jnp.float32

    # Tile-size selection: multiple of 8 rows, capped for VMEM, and small enough that small
    # batches still produce >= MIN_TILES grid steps (v7x megacore utilization).
    tb = min(tb, TB_MAX)
    tb = min(tb, max(SUBLANE, _round_up(pl.cdiv(B, MIN_TILES), SUBLANE)))
    tb = _round_up(tb, SUBLANE)
    n_tiles = pl.cdiv(B, tb)
    Bp = n_tiles * tb

    # x keeps its real lanes in HBM (no 128-lane pad) plus one constant-1 column carrying b1;
    # only the batch axis is zero-padded.
    xb = x.astype(matmul_dtype)
    xb = jnp.concatenate([xb, jnp.ones((B, 1), matmul_dtype)], axis=1)   # (B, 15)
    xp = jnp.pad(xb, ((0, Bp - B), (0, 0)))                              # (Bp, 15)

    # Weights padded to lane tiles; b1 folded into the extra K row of w1.
    w1 = jnp.zeros((N_IN_AUG, LANE), f32)
    w1 = w1.at[:N_INPUT, :N_HIDDEN_1].set(params["w1"].astype(f32))
    w1 = w1.at[N_INPUT, :N_HIDDEN_1].set(params["b1"].astype(f32))
    w1 = w1.astype(matmul_dtype)                                         # (15, 128)

    def padw(w, rows, cols):
        r, c = w.shape
        return jnp.pad(w.astype(f32), ((0, rows - r), (0, cols - c))).astype(matmul_dtype)

    w2 = padw(params["w2"], LANE, LANE)        # (128, 128)
    w3 = padw(params["w3"], LANE, LANE)        # (128, 128)
    w4 = padw(params["w4"], LANE, N_OUT_PAD)   # (128, 8)

    # Remaining bias vectors packed into one (8, 128) f32 slab (rows 0..2 = b2, b3, b4).
    bias = jnp.zeros((SUBLANE, LANE), f32)
    bias = bias.at[0, :N_HIDDEN_2].set(params["b2"].astype(f32))
    bias = bias.at[1, :N_HIDDEN_3].set(params["b3"].astype(f32))
    bias = bias.at[2, :N_OUTPUT].set(params["b4"].astype(f32))

    # Constant block index across grid steps => fetched once, re-used every step.
    resident = lambda a: pl.BlockSpec(a.shape, lambda i: (0, 0))

    out = pl.pallas_call(
        mlp_kernel,
        out_shape=jax.ShapeDtypeStruct((Bp, N_OUT_PAD), jnp.float32),
        grid=(n_tiles,),
        in_specs=[
            pl.BlockSpec((tb, N_IN_AUG), lambda i: (i, 0)),
            resident(w1), resident(w2), resident(w3), resident(w4), resident(bias),
        ],
        out_specs=pl.BlockSpec((tb, N_OUT_PAD), lambda i: (i, 0)),
        compiler_params=pltpu.CompilerParams(
            dimension_semantics=("parallel",),
            vmem_limit_bytes=VMEM_LIMIT_BYTES,
        ),
    )(xp, w1, w2, w3, w4, bias)

    # Padded output lanes 5..7 hold sigmoid(0)=0.5 and padded batch rows hold garbage;
    # both are sliced away here and must never be consumed from the raw (Bp, 8) buffer.
    return out[:B, :N_OUTPUT]


def init_params(key):
    """Deterministic parameter init (Kaiming-uniform-ish, matching torch Linear scale)."""
    dims = [(N_INPUT, N_HIDDEN_1), (N_HIDDEN_1, N_HIDDEN_2),
            (N_HIDDEN_2, N_HIDDEN_3), (N_HIDDEN_3, N_OUTPUT)]
    params = {}
    keys = jax.random.split(key, 2 * len(dims))
    for i, (fan_in, fan_out) in enumerate(dims):
        bound = 1.0 / jnp.sqrt(jnp.float32(fan_in))
        params[f"w{i+1}"] = jax.random.uniform(
            keys[2 * i], (fan_in, fan_out), jnp.float32, -bound, bound)
        params[f"b{i+1}"] = jax.random.uniform(
            keys[2 * i + 1], (fan_out,), jnp.float32, -bound, bound)
    return params


def mlp_reference(x, params):
    h = x @ params["w1"] + params["b1"]
    h = jnp.where(h >= 0, h, NEG_SLOPE * h)
    h = h @ params["w2"] + params["b2"]
    h = jnp.where(h >= 0, h, NEG_SLOPE * h)
    h = h @ params["w3"] + params["b3"]
    h = jnp.where(h >= 0, h, NEG_SLOPE * h)
    h = h @ params["w4"] + params["b4"]
    return jax.nn.sigmoid(h)


if __name__ == "__main__":
    key = jax.random.PRNGKey(0)
    k_param, k_x1, k_x2 = jax.random.split(key, 3)

    params = init_params(k_param)

    # Small batch (single grid step).  f32 matmul path first: tight check of kernel math
    # (padding, bias fold, activation) against the pure-JAX reference.
    x_small = jax.random.normal(k_x1, (8, N_INPUT), dtype=jnp.float32)
    y_small_ref = mlp_reference(x_small, params)
    y_small_f32 = jax.block_until_ready(
        mlp_forward(x_small, params, matmul_dtype=jnp.float32))
    assert y_small_f32.shape == (8, N_OUTPUT), y_small_f32.shape
    assert jnp.allclose(y_small_f32, y_small_ref, atol=1e-5, rtol=1e-5), "f32 small mismatch"

    # Default path (bf16 matmul inputs, f32 accumulation) on the small batch.
    y_small = jax.block_until_ready(mlp_forward(x_small, params))
    assert jnp.allclose(y_small, y_small_ref, atol=5e-2, rtol=5e-2), "bf16 small mismatch"

    # Larger batch exercising a multi-step (pipelined, megacore-parallel) grid + row padding:
    # B=200 -> tb=56, grid=(4,).
    x_big = jax.random.normal(k_x2, (200, N_INPUT), dtype=jnp.float32)
    y_big_ref = mlp_reference(x_big, params)
    y_big = jax.block_until_ready(mlp_forward(x_big, params))
    assert y_big.shape == (200, N_OUTPUT), y_big.shape
    assert jnp.allclose(y_big, y_big_ref, atol=5e-2, rtol=5e-2), "bf16 multi-tile mismatch"

    # f32 matmul variant on the multi-tile grid (tight check of the tiling/padding logic).
    y_big_f32 = jax.block_until_ready(
        mlp_forward(x_big, params, matmul_dtype=jnp.float32))
    assert jnp.allclose(y_big_f32, y_big_ref, atol=1e-5, rtol=1e-5), "f32 multi-tile mismatch"

    print("KERNEL_OK")
</pallas_src>

<mosaic_0001>
module attributes {stable_mosaic.version = 11 : i64} {
  func.func @mlp_kernel(%arg0: i32, %arg1: memref<8x15xf32, #tpu.memory_space<vmem>>, %arg2: memref<15x128xf32, #tpu.memory_space<vmem>>, %arg3: memref<128x128xf32, #tpu.memory_space<vmem>>, %arg4: memref<128x128xf32, #tpu.memory_space<vmem>>, %arg5: memref<128x8xf32, #tpu.memory_space<vmem>>, %arg6: memref<8x128xf32, #tpu.memory_space<vmem>>, %arg7: memref<8x8xf32, #tpu.memory_space<vmem>>) attributes {dimension_semantics = [#tpu.dimension_semantics<parallel>], iteration_bounds = array<i64: 1>, scalar_prefetch = 0 : i64, scratch_operands = 0 : i64, tpu.core_type = #tpu.core_type<tc>, window_params = [{transform_indices = @transform_0, window_bounds = array<i64: 8, 15>}, {pipeline_mode = #tpu.pipeline_mode<synchronous>, transform_indices = @transform_1, window_bounds = array<i64: 15, 128>}, {pipeline_mode = #tpu.pipeline_mode<synchronous>, transform_indices = @transform_2, window_bounds = array<i64: 128, 128>}, {pipeline_mode = #tpu.pipeline_mode<synchronous>, transform_indices = @transform_3, window_bounds = array<i64: 128, 128>}, {pipeline_mode = #tpu.pipeline_mode<synchronous>, transform_indices = @transform_4, window_bounds = array<i64: 128, 8>}, {pipeline_mode = #tpu.pipeline_mode<synchronous>, transform_indices = @transform_5, window_bounds = array<i64: 8, 128>}, {transform_indices = @transform_6, window_bounds = array<i64: 8, 8>}]} {
    %c0 = arith.constant 0 : index
    %c0_0 = arith.constant 0 : index
    %0 = vector.load %arg6[%c0, %c0_0] : memref<8x128xf32, #tpu.memory_space<vmem>>, vector<8x128xf32>
    %c0_1 = arith.constant 0 : index
    %c0_2 = arith.constant 0 : index
    %1 = vector.load %arg1[%c0_1, %c0_2] : memref<8x15xf32, #tpu.memory_space<vmem>>, vector<8x15xf32>
    %c0_3 = arith.constant 0 : index
    %c0_4 = arith.constant 0 : index
    %2 = vector.load %arg2[%c0_3, %c0_4] : memref<15x128xf32, #tpu.memory_space<vmem>>, vector<15x128xf32>
    %cst = arith.constant dense<0.000000e+00> : vector<8x128xf32>
    %3 = tpu.matmul %1, %2, %cst {dimension_numbers = #tpu.dot_dimension_numbers<[1], [0], [0], [1], [0, 0, 1, 1], [], []>} : vector<8x15xf32>, vector<15x128xf32>, vector<8x128xf32> -> vector<8x128xf32>
    %cst_5 = arith.constant 0.00999999977 : f32
    %4 = vector.broadcast %cst_5 : f32 to vector<8x128xf32>
    %5 = arith.mulf %4, %3 : vector<8x128xf32>
    %6 = arith.maximumf %3, %5 : vector<8x128xf32>
    %c0_6 = arith.constant 0 : index
    %c0_7 = arith.constant 0 : index
    %7 = vector.load %arg3[%c0_6, %c0_7] : memref<128x128xf32, #tpu.memory_space<vmem>>, vector<128x128xf32>
    %cst_8 = arith.constant dense<0.000000e+00> : vector<8x128xf32>
    %8 = tpu.matmul %6, %7, %cst_8 {dimension_numbers = #tpu.dot_dimension_numbers<[1], [0], [0], [1], [0, 0, 1, 1], [], []>} : vector<8x128xf32>, vector<128x128xf32>, vector<8x128xf32> -> vector<8x128xf32>
    %9 = vector.extract_strided_slice %0 {offsets = [0, 0], sizes = [1, 128], strides = [1, 1]} : vector<8x128xf32> to vector<1x128xf32>
    %10 = vector.broadcast %9 : vector<1x128xf32> to vector<8x128xf32>
    %11 = arith.addf %8, %10 : vector<8x128xf32>
    %cst_9 = arith.constant 0.00999999977 : f32
    %12 = vector.broadcast %cst_9 : f32 to vector<8x128xf32>
    %13 = arith.mulf %12, %11 : vector<8x128xf32>
    %14 = arith.maximumf %11, %13 : vector<8x128xf32>
    %c0_10 = arith.constant 0 : index
    %c0_11 = arith.constant 0 : index
    %15 = vector.load %arg4[%c0_10, %c0_11] : memref<128x128xf32, #tpu.memory_space<vmem>>, vector<128x128xf32>
    %cst_12 = arith.constant dense<0.000000e+00> : vector<8x128xf32>
    %16 = tpu.matmul %14, %15, %cst_12 {dimension_numbers = #tpu.dot_dimension_numbers<[1], [0], [0], [1], [0, 0, 1, 1], [], []>} : vector<8x128xf32>, vector<128x128xf32>, vector<8x128xf32> -> vector<8x128xf32>
    %17 = vector.extract_strided_slice %0 {offsets = [1, 0], sizes = [1, 128], strides = [1, 1]} : vector<8x128xf32> to vector<1x128xf32>
    %18 = vector.broadcast %17 : vector<1x128xf32> to vector<8x128xf32>
    %19 = arith.addf %16, %18 : vector<8x128xf32>
    %cst_13 = arith.constant 0.00999999977 : f32
    %20 = vector.broadcast %cst_13 : f32 to vector<8x128xf32>
    %21 = arith.mulf %20, %19 : vector<8x128xf32>
    %22 = arith.maximumf %19, %21 : vector<8x128xf32>
    %c0_14 = arith.constant 0 : index
    %c0_15 = arith.constant 0 : index
    %23 = vector.load %arg5[%c0_14, %c0_15] : memref<128x8xf32, #tpu.memory_space<vmem>>, vector<128x8xf32>
    %cst_16 = arith.constant dense<0.000000e+00> : vector<8x8xf32>
    %24 = tpu.matmul %22, %23, %cst_16 {dimension_numbers = #tpu.dot_dimension_numbers<[1], [0], [0], [1], [0, 0, 1, 1], [], []>} : vector<8x128xf32>, vector<128x8xf32>, vector<8x8xf32> -> vector<8x8xf32>
    %25 = vector.extract_strided_slice %0 {offsets = [2, 0], sizes = [1, 8], strides = [1, 1]} : vector<8x128xf32> to vector<1x8xf32>
    %26 = vector.broadcast %25 : vector<1x8xf32> to vector<8x8xf32>
    %27 = arith.addf %24, %26 : vector<8x8xf32>
    %28 = arith.negf %27 : vector<8x8xf32>
    %29 = math.exp %28 : vector<8x8xf32>
    %cst_17 = arith.constant 1.000000e+00 : f32
    %30 = vector.broadcast %cst_17 : f32 to vector<8x8xf32>
    %31 = arith.addf %30, %29 : vector<8x8xf32>
    %32 = arith.divf %30, %31 : vector<8x8xf32>
    %c0_18 = arith.constant 0 : index
    %c0_19 = arith.constant 0 : index
    %33 = vector.load %arg7[%c0_18, %c0_19] : memref<8x8xf32, #tpu.memory_space<vmem>>, vector<8x8xf32>
    tpu.vector_store %arg7[%c0_18, %c0_19], %32 {strides = array<i32>} : memref<8x8xf32, #tpu.memory_space<vmem>>, vector<8x8xf32>,
    return
  }
  func.func @transform_0(%arg0: i32) -> (i32, i32) {
    %c0_i32 = arith.constant 0 : i32
    %c0_i32_0 = arith.constant 0 : i32
    return %arg0, %c0_i32 : i32, i32
  }
  func.func @transform_1(%arg0: i32) -> (i32, i32) {
    %c0_i32 = arith.constant 0 : i32
    %c0_i32_0 = arith.constant 0 : i32
    %c0_i32_1 = arith.constant 0 : i32
    return %c0_i32, %c0_i32_0 : i32, i32
  }
  func.func @transform_2(%arg0: i32) -> (i32, i32) {
    %c0_i32 = arith.constant 0 : i32
    %c0_i32_0 = arith.constant 0 : i32
    %c0_i32_1 = arith.constant 0 : i32
    return %c0_i32, %c0_i32_0 : i32, i32
  }
  func.func @transform_3(%arg0: i32) -> (i32, i32) {
    %c0_i32 = arith.constant 0 : i32
    %c0_i32_0 = arith.constant 0 : i32
    %c0_i32_1 = arith.constant 0 : i32
    return %c0_i32, %c0_i32_0 : i32, i32
  }
  func.func @transform_4(%arg0: i32) -> (i32, i32) {
    %c0_i32 = arith.constant 0 : i32
    %c0_i32_0 = arith.constant 0 : i32
    %c0_i32_1 = arith.constant 0 : i32
    return %c0_i32, %c0_i32_0 : i32, i32
  }
  func.func @transform_5(%arg0: i32) -> (i32, i32) {
    %c0_i32 = arith.constant 0 : i32
    %c0_i32_0 = arith.constant 0 : i32
    %c0_i32_1 = arith.constant 0 : i32
    return %c0_i32, %c0_i32_0 : i32, i32
  }
  func.func @transform_6(%arg0: i32) -> (i32, i32) {
    %c0_i32 = arith.constant 0 : i32
    %c0_i32_0 = arith.constant 0 : i32
    return %arg0, %c0_i32 : i32, i32
  }
}

</mosaic_0001>

<bundles_post_ra>
// kernel: tpu_custom_call.1
= control target key start
LH: loop header
LB: loop body
LE: loop exit
PB: predicated region body
PF: predicated region fallthrough
CT: control target
= control target key end

     0   :  { %11 = vsyncpa [#allocation3], 0  ;;  %s524_s0 = inlined_call_operand.vmem [shape: f32[8,15], index: 0, kind: input, shape index: {}]   ;;  %s525_s1 = inlined_call_operand.hbm [shape: f32[15,128], index: 1, kind: input, shape index: {}]   ;;  %s526_s2 = inlined_call_operand.vmem [shape: f32[128,128], index: 2, kind: input, shape index: {}]   ;;  %s527_s3 = inlined_call_operand.hbm [shape: f32[128,128], index: 3, kind: input, shape index: {}]   ;;  %s528_s4 = inlined_call_operand.vmem [shape: f32[128,8], index: 4, kind: input, shape index: {}]   ;;  %s529_s5 = inlined_call_operand.hbm [shape: f32[8,128], index: 5, kind: input, shape index: {}]   ;;  %s530_s6 = inlined_call_operand.hbm [shape: f32[8,8], index: 6, kind: output, shape index: {}]  }
   0x1   :  { %12 = vsyncpa [#allocation6], 0 }
   0x2   :  { %13 = vsyncpa [#allocation4], 0  ;;  %s35_s23 = sshll.u32 %s527_s3, 4  ;;  %s372_s24 = smov [#allocation5]   ;;  %s36_s23 = int_to_ptr.hbm [resolvable:$true] %s35_s23 }
   0x3   :  { %s37_s25 = sshll.u32 %s372_s24, 4  ;;  %s20_s28 = sshll.u32 %s525_s1, 4  ;;  %s38_s25 = int_to_ptr.vmem [resolvable:$true] %s37_s25  ;;  %s21_s28 = int_to_ptr.hbm [resolvable:$true] %s20_s28 }
   0x4   :  { %s373_s29 = smov 128   ;;  %s374_s30 = smov 8  }
   0x5   :  { %43 = dma.hbm_to_vmem [thread:$0]  %s36_s23, 2048, %s38_s25, [#allocation6], %s373_s29, %s373_s29, %s374_s30  }
   0x6   :  { %s375_s7 = smov [#allocation2]   ;;  %s51_s11 = sshll.u32 %s529_s5, 4  ;;  %s52_s11 = int_to_ptr.hbm [resolvable:$true] %s51_s11 }
   0x7   :  { %s22_s8 = sshll.u32 %s375_s7, 4  ;;  %s376_s3 = smov [#allocation7]   ;;  %s23_s8 = int_to_ptr.vmem [resolvable:$true] %s22_s8 }
   0x8   :  { %28 = dma.hbm_to_vmem [thread:$0]  %s21_s28, 256, %s23_s8, [#allocation3], %s373_s29, %s373_s29, %s374_s30  }
   0x9   :  { %s53_s12 = sshll.u32 %s376_s3, 4  ;;  %s54_s12 = int_to_ptr.vmem [resolvable:$true] %s53_s12 }
   0xa   :  { %56 = dma.hbm_to_vmem [thread:$0]  %s52_s11, 128, %s54_s12, [#allocation6]  }
   0xb   :  { %366 = dma.done.wait [#allocation3], 256  }
   0xc   :  { %367 = vsyncadd [#allocation3], 4294967040 }
   0xd   :  { %368 = dma.done.wait [#allocation6], 2176  }
   0xe   :  { %369 = vsyncadd [#allocation6], 4294965120  ;;  %vm77_vm0 = vcmask 1046528   ;;  %v72_v0 = vld [vmem:[#allocation2 + $0x8] sm:$0x7f]  ;;  %v71_v1 = vld [vmem:[#allocation2] sm:$0xff] }
   0xf   :  { %257 = vmatpush.msk.msra.mxu0 %vm77_vm0, %v72_v0  ;;  %v70_v2 = vld [vmem:[%s524_s0] sm:$0xff]  ;;  %vm73_vm1 = vcmask 121856   ;;  %v118_v3 = vld [vmem:[%s526_s2 + $0x78] sm:$0xff]  ;;  %v117_v4 = vld [vmem:[%s526_s2 + $0x70] sm:$0xff]  ;;  %s246_s21 = sshll.u32 %s530_s6, 4  ;;  %vm237_vm5 = vcmask 64512   ;;  %s247_s21 = int_to_ptr.hbm [resolvable:$true] %s246_s21 }
  0x10   :  { %120 = vmatpush.msra.mxu1 %v118_v3  ;;  %v116_v5 = vld [vmem:[%s526_s2 + $0x68] sm:$0xff]  ;;  %v115_v6 = vld [vmem:[%s526_s2 + $0x60] sm:$0xff]  ;;  %v114_v7 = vld [vmem:[%s526_s2 + $0x58] sm:$0xff] }
  0x11   :  { %96 = vmatpush.msra.mxu0 %v71_v1  ;;  %v113_v8 = vld [vmem:[%s526_s2 + $0x50] sm:$0xff]  ;;  %v112_v9 = vld [vmem:[%s526_s2 + $0x48] sm:$0xff]  ;;  %v111_v10 = vld [vmem:[%s526_s2 + $0x40] sm:$0xff] }
  0x12   :  { %258 = vmatmul.msk.f32.vlgmr.msra.gmra.mxu0 %vm73_vm1, %v70_v2  ;;  %121 = vmatpush.msra.mxu1 %v117_v4  ;;  %v110_v11 = vld [vmem:[%s526_s2 + $0x38] sm:$0xff]  ;;  %v109_v12 = vld [vmem:[%s526_s2 + $0x30] sm:$0xff]  ;;  %v108_v13 = vld [vmem:[%s526_s2 + $0x28] sm:$0xff] }
  0x13   :  { %v107_v14 = vld [vmem:[%s526_s2 + $0x20] sm:$0xff]  ;;  %v106_v15 = vld [vmem:[%s526_s2 + $0x18] sm:$0xff]  ;;  %v105_v16 = vld [vmem:[%s526_s2 + $0x10] sm:$0xff] }
  0x14   :  { %122 = vmatpush.msra.mxu1 %v116_v5  ;;  %v104_v17 = vld [vmem:[%s526_s2 + $0x8] sm:$0xff]  ;;  %v103_v18 = vld [vmem:[%s526_s2] sm:$0xff]  ;;  %v155_v21 = vld [vmem:[#allocation5 + $0x68] sm:$0xff] }
  0x15   :  { %v157_v19 = vld [vmem:[#allocation5 + $0x78] sm:$0xff]  ;;  %v156_v20 = vld [vmem:[#allocation5 + $0x70] sm:$0xff]  ;;  %v154_v22 = vld [vmem:[#allocation5 + $0x60] sm:$0xff] }
  0x16   :  { %123 = vmatpush.msra.mxu1 %v115_v6  ;;  %159 = vmatpush.msra.mxu2 %v157_v19  ;;  %v153_v23 = vld [vmem:[#allocation5 + $0x58] sm:$0xff]  ;;  %v152_v24 = vld [vmem:[#allocation5 + $0x50] sm:$0xff]  ;;  %v151_v25 = vld [vmem:[#allocation5 + $0x48] sm:$0xff] }
  0x17   :  { %v150_v26 = vld [vmem:[#allocation5 + $0x40] sm:$0xff]  ;;  %v149_v27 = vld [vmem:[#allocation5 + $0x38] sm:$0xff]  ;;  %v148_v28 = vld [vmem:[#allocation5 + $0x30] sm:$0xff] }
  0x18   :  { %124 = vmatpush.msra.mxu1 %v114_v7  ;;  %160 = vmatpush.msra.mxu2 %v156_v20  ;;  %v147_v29 = vld [vmem:[#allocation5 + $0x28] sm:$0xff]  ;;  %v146_v30 = vld [vmem:[#allocation5 + $0x20] sm:$0xff]  ;;  %v145_v34 = vld [vmem:[#allocation5 + $0x18] sm:$0xff] }
  0x19   :  { %v144_v35 = vld [vmem:[#allocation5 + $0x10] sm:$0xff]  ;;  %v143_v36 = vld [vmem:[#allocation5 + $0x8] sm:$0xff]  ;;  %v142_v37 = vld [vmem:[#allocation5] sm:$0xff] }
  0x1a   :  { %125 = vmatpush.msra.mxu1 %v113_v8  ;;  %161 = vmatpush.msra.mxu2 %v155_v21  ;;  %v196_v38 = vld [vmem:[%s528_s4 + $0x78] sm:$0xff]  ;;  %v195_v39 = vld [vmem:[%s528_s4 + $0x70] sm:$0xff]  ;;  %v194_v40 = vld [vmem:[%s528_s4 + $0x68] sm:$0xff] }
  0x1b   :  { %198 = vmatpush.msra.mxu3 %v196_v38  ;;  %v193_v41 = vld [vmem:[%s528_s4 + $0x60] sm:$0xff]  ;;  %v192_v42 = vld [vmem:[%s528_s4 + $0x58] sm:$0xff]  ;;  %v191_v43 = vld [vmem:[%s528_s4 + $0x50] sm:$0xff] }
  0x1c   :  { %126 = vmatpush.msra.mxu1 %v112_v9  ;;  %162 = vmatpush.msra.mxu2 %v154_v22  ;;  %v190_v44 = vld [vmem:[%s528_s4 + $0x48] sm:$0xff]  ;;  %v189_v45 = vld [vmem:[%s528_s4 + $0x40] sm:$0xff]  ;;  %v188_v46 = vld [vmem:[%s528_s4 + $0x38] sm:$0xff] }
  0x1d   :  { %199 = vmatpush.msra.mxu3 %v195_v39  ;;  %v187_v47 = vld [vmem:[%s528_s4 + $0x30] sm:$0xff]  ;;  %v186_v48 = vld [vmem:[%s528_s4 + $0x28] sm:$0xff]  ;;  %v185_v50 = vld [vmem:[%s528_s4 + $0x20] sm:$0xff] }
  0x1e   :  { %127 = vmatpush.msra.mxu1 %v111_v10  ;;  %163 = vmatpush.msra.mxu2 %v153_v23  ;;  %v69_v49 = vld [vmem:[#allocation7] sm:$0xff]  ;;  %v184_v56 = vld [vmem:[%s528_s4 + $0x18] sm:$0xff]  ;;  %v182_v58 = vld [vmem:[%s528_s4 + $0x8] sm:$0xff] }
  0x1f   :  { %200 = vmatpush.msra.mxu3 %v194_v40  ;;  %v119_v51 = vperm.slane %v69_v49, 0  ;;  %v183_v57 = vld [vmem:[%s528_s4 + $0x10] sm:$0xff]  ;;  %v181_v59 = vld [vmem:[%s528_s4] sm:$0xff]  ;;  %v158_v60 = vperm.slane %v69_v49, 1  ;;  %v197_v1 = vperm.slane %v69_v49, 2  ;;  %s377_s4 = smov [#allocation8]  }
  0x20   :  { %128 = vmatpush.msra.mxu1 %v110_v11  ;;  %164 = vmatpush.msra.mxu2 %v152_v24  ;;  %s244_s19 = sshll.u32 %s377_s4, 4  ;;  %s245_s19 = int_to_ptr.vmem [resolvable:$true] %s244_s19 }
  0x21   :  { %201 = vmatpush.msra.mxu3 %v193_v41 }
  0x22   :  { %129 = vmatpush.msra.mxu1 %v109_v12  ;;  %165 = vmatpush.msra.mxu2 %v151_v25 }
  0x23   :  { %202 = vmatpush.msra.mxu3 %v192_v42 }
  0x24   :  { %130 = vmatpush.msra.mxu1 %v108_v13  ;;  %166 = vmatpush.msra.mxu2 %v150_v26 }
  0x25   :  { %203 = vmatpush.msra.mxu3 %v191_v43 }
  0x26   :  { %131 = vmatpush.msra.mxu1 %v107_v14  ;;  %167 = vmatpush.msra.mxu2 %v149_v27 }
  0x27   :  { %204 = vmatpush.msra.mxu3 %v190_v44 }
  0x28   :  { %132 = vmatpush.msra.mxu1 %v106_v15  ;;  %168 = vmatpush.msra.mxu2 %v148_v28 }
  0x29   :  { %205 = vmatpush.msra.mxu3 %v189_v45 }
  0x2a   :  { %133 = vmatpush.msra.mxu1 %v105_v16  ;;  %169 = vmatpush.msra.mxu2 %v147_v29 }
  0x2b   :  { %206 = vmatpush.msra.mxu3 %v188_v46 }
  0x2c   :  { %134 = vmatpush.msra.mxu1 %v104_v17  ;;  %170 = vmatpush.msra.mxu2 %v146_v30 }
  0x2d   :  { %207 = vmatpush.msra.mxu3 %v187_v47 }
  0x2e   :  { %135 = vmatpush.msra.mxu1 %v103_v18  ;;  %171 = vmatpush.msra.mxu2 %v145_v34 }
  0x2f   :  { %208 = vmatpush.msra.mxu3 %v186_v48 }
  0x30   :  { %172 = vmatpush.msra.mxu2 %v144_v35 }
  0x31   :  { %209 = vmatpush.msra.mxu3 %v185_v50 }
  0x32   :  { %173 = vmatpush.msra.mxu2 %v143_v36 }
  0x33   :  { %210 = vmatpush.msra.mxu3 %v184_v56 }
  0x34   :  { %174 = vmatpush.msra.mxu2 %v142_v37 }
  0x35   :  { %211 = vmatpush.msra.mxu3 %v183_v57 }
  0x37   :  { %212 = vmatpush.msra.mxu3 %v182_v58 }
  0x39   :  { %213 = vmatpush.msra.mxu3 %v181_v59 }
  0x8f   :  { %v98_v31 = vpop.f32.mrf.mxu0 }
  0x90   :  { %v101_v32 = vmul.f32 0.01, %v98_v31 }
  0x92   :  { %v102_v33 = vmax.f32 %v98_v31, %v101_v32 }
  0x94   :  { %136 = vmatmul.f32.vlgmr.msra.gmra.mxu1 %v102_v33 }
 0x111   :  { %v137_v52 = vpop.f32.mrf.mxu1 }
 0x112   :  { %v138_v53 = vadd.f32 %v137_v52, %v119_v51 }
 0x114   :  { %v140_v54 = vmul.f32 0.01, %v138_v53 }
 0x116   :  { %v141_v55 = vmax.f32 %v138_v53, %v140_v54 }
 0x118   :  { %175 = vmatmul.f32.vlgmr.msra.gmra.mxu2 %v141_v55 }
 0x19b   :  { %v176_v61 = vpop.f32.mrf.mxu2 }
 0x19c   :  { %v177_v62 = vadd.f32 %v176_v61, %v158_v60 }
 0x19e   :  { %v179_v63 = vmul.f32 0.01, %v177_v62 }
 0x1a0   :  { %v180_v0 = vmax.f32 %v177_v62, %v179_v63 }
 0x1a2   :  { %214 = vmatmul.f32.vlgmr.msra.gmra.mxu3 %v180_v0 }
 0x225   :  { %v215_v2 = vpop.f32.mrf.mxu3 }
 0x226   :  { %v216_v3 = vadd.f32 %v215_v2, %v197_v1 }
 0x228   :  { %v259_v4 = vmul.f32 -1.442695, %v216_v3 }
 0x22a   :  { %266 = vpow2.f32 %v259_v4 }
 0x230   :  { %v267_v5 = vpop.eup %266 }
 0x231   :  { %v221_v6 = vadd.f32 1.0, %v267_v5 }
 0x233   :  { %268 = vrcp.f32 %v221_v6  ;;  %v233_v10 = vand.u32 2147483648, %v221_v6  ;;  %v231_v12 = vand.u32 2147483647, %v221_v6  ;;  %vm227_vm3 = vweird.f32 %v221_v6 }
 0x235   :  { %v234_v14 = vor.u32 1.1754944e-38, %v233_v10  ;;  %vm232_vm6 = vcmp.eq.f32.partialorder %v231_v12, 8.507059e+37 }
 0x239   :  { %v269_v7 = vpop.eup %268 }
 0x23a   :  { %v223_v8 = vmul.f32 %v269_v7, %v221_v6  ;;  %vm228_vm2 = vweird.f32 %v269_v7 }
 0x23b   :  { %vm229_vm4 = vmor %vm227_vm3, %vm228_vm2 }
 0x23c   :  { %v224_v9 = vsub.f32 1.0, %v223_v8 }
 0x23e   :  { %v225_v11 = vmul.f32 %v269_v7, %v224_v9 }
 0x240   :  { %v226_v13 = vadd.f32 %v269_v7, %v225_v11 }
 0x242   :  { %v230_v15 = vsel %vm229_vm4, %v269_v7, %v226_v13 }
 0x243   :  { %v235_v16 = vsel %vm232_vm6, %v234_v14, %v230_v15 }
 0x244   :  { %238 = vst.msk [vmem:[#allocation8] sm:$0xff] %vm237_vm5, %v235_v16 }
 0x245   :  { %249 = dma.vmem_to_hbm [thread:$0]  %s245_s19, 128, %s247_s21, [#allocation4]  }
 0x246   :  { %370 = dma.done.wait [#allocation4], 128  }
 0x247   :  { %371 = vsyncadd [#allocation4], 4294967168 }
 0x248   :  { %254 = vsyncpa [#allocation3], 1 }
 0x249   :  { %255 = vsyncpa [#allocation6], 1 }
 0x24a   :  { %256 = vsyncpa [#allocation4], 1 }

</bundles_post_ra>
